<compile_context>
chip_gen: v7x
topology: tpu7x:2x2x1
jax: 0.10.0
libtpu: 0.0.40
codegen_flags: <defaults>
</compile_context>

<pallas_src>
import functools

import jax
import jax.numpy as jnp
from jax.experimental import pallas as pl
from jax.experimental.pallas import tpu as pltpu


def _vmem_budget():
    """Returns (f32 working-set budget per logits block, scoped VMEM limit)."""
    try:
        kind = jax.devices()[0].device_kind.lower()
    except Exception:
        kind = ""
    if "v7" in kind:
        # v7x: 64 MiB physical VMEM per TensorCore -> keep 2x-buffered inputs
        # + compiler intermediates comfortably under the 32 MiB scoped limit.
        return 4 * 1024 * 1024, 32 * 1024 * 1024
    # v5e / v6e: 128 MiB physical VMEM -> larger blocks, raise scoped limit.
    return 8 * 1024 * 1024, 64 * 1024 * 1024


def _dice_partials_kernel(scalars_ref, logits_ref, labels_ref,
                          inter_ref, t_ref, *, hw, ignore_index, exp_in_bf16):
    j = pl.program_id(1)

    x = logits_ref[...].astype(jnp.float32)                 # (C, TM)
    C, TM = x.shape

    # --- in-kernel ignore_index rewrite (scalars prefetched into SMEM) ---
    labels = labels_ref[...]                                 # (1, TM) int32
    do_replace = scalars_ref[0] != 0
    tmin = scalars_ref[1]
    labels = jnp.where(
        jnp.logical_and(do_replace, labels == ignore_index), tmin, labels)

    # --- softmax pieces over the channel (sublane) axis ---
    m = jnp.max(x, axis=0, keepdims=True)                    # (1, TM)
    xm = x - m                                               # <= 0
    if exp_in_bf16:
        # EUP throughput x2 via bf16 packing (v6e/v7x); accumulate in f32.
        e = jnp.exp(xm.astype(jnp.bfloat16)).astype(jnp.float32)
    else:
        e = jnp.exp(xm)                                      # (C, TM)  (EUP)
    sum_e = jnp.sum(e, axis=0, keepdims=True)                # (1, TM)

    # True-class numerator via one-hot select + cross-sublane reduce
    # (avoids materializing the full softmax / a (C, TM) divide).
    ch = jax.lax.broadcasted_iota(jnp.int32, (C, TM), 0)     # (C, TM)
    onehot = ch == labels                                    # (C, TM) bool
    e_lab = jnp.sum(jnp.where(onehot, e, 0.0),
                    axis=0, keepdims=True)                   # (1, TM)

    # Lane validity (partial edge blocks) and label validity (one-hot term).
    lane = jax.lax.broadcasted_iota(jnp.int32, (1, TM), 1)
    lane_ok = (j * TM + lane) < hw
    lab_ok = jnp.logical_and(labels >= 0, labels < C)

    # True-class softmax prob; approximate reciprocal runs on the EUP slot.
    p_lab = e_lab * pl.reciprocal(sum_e, approx=True)        # (1, TM)

    # Per-block partial reductions.  Keep jnp.where selects (not mask
    # multiplies) so stale/NaN data in masked-off lanes never propagates.
    # Note: lab_ok is not needed for `inter` (one-hot already yields 0 there).
    inter = jnp.sum(jnp.where(lane_ok, p_lab, 0.0))
    t_sum = jnp.sum(jnp.where(jnp.logical_and(lane_ok, lab_ok), 1.0, 0.0))

    # Lane-dense (8,128) output tiles -> unmasked vector stores; wrapper
    # reads [0, 0] of each tile and reduces.
    inter_ref[...] = jnp.broadcast_to(inter, (8, 128)).astype(jnp.float32)
    t_ref[...] = jnp.broadcast_to(t_sum, (8, 128)).astype(jnp.float32)


def dice_loss(output, target, *, smooth=1.0, ignore_index=255,
              exp_in_bf16=False):
    """output: (N, C, H, W) float (f32 or bf16) logits; target: (N, H, W) ints."""
    N, C, H, W = output.shape
    HW = H * W

    target = target.astype(jnp.int32)

    # --- ignore_index decision (mirrors the PyTorch data-dependent branch);
    #     one small fused XLA reduction, the rewrite itself happens in-kernel.
    tmin = jnp.min(target)
    tmax = jnp.max(target)
    # `ignore_index not in range(min, max)`  ==  not (min <= ii < max)
    in_range = jnp.logical_and(ignore_index >= tmin, ignore_index < tmax)
    has_ignore = jnp.sum(target == ignore_index) > 0
    do_replace = jnp.logical_and(jnp.logical_not(in_range), has_ignore)
    scalars = jnp.stack([do_replace.astype(jnp.int32), tmin])   # (2,) int32

    # --- free reshapes (no transpose, no extra HBM copy) ---
    logits = output.reshape(N, C, HW)      # (N, C, HW)
    labels = target.reshape(N, 1, HW)      # (N, 1, HW)

    # --- spatial tile from a per-generation VMEM budget (128-lane aligned) ---
    budget_f32, vmem_limit = _vmem_budget()
    tm_budget = max(128, (budget_f32 // (4 * C)) // 128 * 128)
    tm = min(tm_budget, pl.cdiv(HW, 128) * 128)
    num_j = pl.cdiv(HW, tm)

    kernel = functools.partial(
        _dice_partials_kernel, hw=HW, ignore_index=int(ignore_index),
        exp_in_bf16=bool(exp_in_bf16))

    inter_p, t_p = pl.pallas_call(
        kernel,
        out_shape=(
            jax.ShapeDtypeStruct((N, num_j, 8, 128), jnp.float32),
            jax.ShapeDtypeStruct((N, num_j, 8, 128), jnp.float32),
        ),
        grid_spec=pltpu.PrefetchScalarGridSpec(
            num_scalar_prefetch=1,
            grid=(N, num_j),
            in_specs=[
                pl.BlockSpec((None, C, tm), lambda n, j, s: (n, 0, j)),
                pl.BlockSpec((None, 1, tm), lambda n, j, s: (n, 0, j)),
            ],
            out_specs=(
                pl.BlockSpec((None, None, 8, 128), lambda n, j, s: (n, j, 0, 0)),
                pl.BlockSpec((None, None, 8, 128), lambda n, j, s: (n, j, 0, 0)),
            ),
        ),
        compiler_params=pltpu.CompilerParams(
            # No cross-grid accumulator anymore -> both axes are parallel
            # (dual-TensorCore sharding on v7x; harmless on v5e/v6e).
            dimension_semantics=("parallel", "parallel"),
            vmem_limit_bytes=vmem_limit,
        ),
    )(scalars, logits, labels)

    inter = jnp.sum(inter_p[:, :, 0, 0])
    t_sum = jnp.sum(t_p[:, :, 0, 0])
    # sum(softmax) over all positions == number of positions.
    p_total = jnp.float32(N * HW)
    return 1.0 - (2.0 * inter + smooth) / (p_total + t_sum + smooth)


def _dice_loss_ref(output, target, smooth=1.0, ignore_index=255):
    """Pure-JAX reference mirroring the PyTorch forward."""
    N, C, H, W = output.shape
    target = target.astype(jnp.int32)
    tmin, tmax = jnp.min(target), jnp.max(target)
    in_range = jnp.logical_and(ignore_index >= tmin, ignore_index < tmax)
    has_ignore = jnp.sum(target == ignore_index) > 0
    do_replace = jnp.logical_and(jnp.logical_not(in_range), has_ignore)
    target = jnp.where(
        jnp.logical_and(do_replace, target == ignore_index), tmin, target)
    onehot = jax.nn.one_hot(target, C, axis=1, dtype=jnp.float32)  # (N,C,H,W)
    prob = jax.nn.softmax(output.astype(jnp.float32), axis=1)
    of, tf = prob.reshape(-1), onehot.reshape(-1)
    inter = jnp.sum(of * tf)
    return 1.0 - (2.0 * inter + smooth) / (jnp.sum(of) + jnp.sum(tf) + smooth)


if __name__ == "__main__":
    key = jax.random.PRNGKey(0)
    k1, k2 = jax.random.split(key)

    N, C, H, W = 2, 4, 16, 16
    logits = jax.random.normal(k1, (N, C, H, W), dtype=jnp.float32)
    labels = jax.random.randint(k2, (N, H, W), 0, C, dtype=jnp.int32)

    loss = jax.block_until_ready(
        dice_loss(logits, labels, smooth=1.0, ignore_index=255))
    ref = jax.block_until_ready(_dice_loss_ref(logits, labels))

    # Tolerance slightly relaxed vs 1e-5 because the kernel uses the EUP
    # approximate reciprocal for the softmax normalization.
    assert jnp.allclose(loss, ref, rtol=1e-3, atol=1e-3), (loss, ref)

    print("KERNEL_OK")
</pallas_src>

<mosaic_0001>
module attributes {stable_mosaic.version = 11 : i64} {
  func.func @_dice_partials_kernel(%arg0: i32, %arg1: i32, %arg2: memref<2xi32, #tpu.memory_space<smem>>, %arg3: memref<1x4x256xf32, #tpu.memory_space<vmem>>, %arg4: memref<1x1x256xi32, #tpu.memory_space<vmem>>, %arg5: memref<1x1x8x128xf32, #tpu.memory_space<vmem>>, %arg6: memref<1x1x8x128xf32, #tpu.memory_space<vmem>>) attributes {dimension_semantics = [#tpu.dimension_semantics<parallel>, #tpu.dimension_semantics<parallel>], iteration_bounds = array<i64: 2, 1>, scalar_prefetch = 1 : i64, scratch_operands = 0 : i64, tpu.core_type = #tpu.core_type<tc>, window_params = [{transform_indices = @transform_0, window_bounds = array<i64: 1, 4, 256>}, {transform_indices = @transform_1, window_bounds = array<i64: 1, 1, 256>}, {transform_indices = @transform_2, window_bounds = array<i64: 1, 1, 8, 128>}, {transform_indices = @transform_3, window_bounds = array<i64: 1, 1, 8, 128>}]} {
    %c0 = arith.constant 0 : index
    %c0_0 = arith.constant 0 : index
    %c0_1 = arith.constant 0 : index
    %0 = vector.load %arg3[%c0, %c0_0, %c0_1] : memref<1x4x256xf32, #tpu.memory_space<vmem>>, vector<1x4x256xf32>
    %1 = vector.shape_cast %0 : vector<1x4x256xf32> to vector<4x256xf32>
    %c0_2 = arith.constant 0 : index
    %c0_3 = arith.constant 0 : index
    %c0_4 = arith.constant 0 : index
    %2 = vector.load %arg4[%c0_2, %c0_3, %c0_4] : memref<1x1x256xi32, #tpu.memory_space<vmem>>, vector<1x1x256xi32>
    %3 = vector.shape_cast %2 : vector<1x1x256xi32> to vector<1x256xi32>
    %c0_5 = arith.constant 0 : index
    %4 = memref.load %arg2[%c0_5] : memref<2xi32, #tpu.memory_space<smem>>
    %c0_i32 = arith.constant 0 : i32
    %5 = arith.cmpi ne, %4, %c0_i32 : i32
    %c1 = arith.constant 1 : index
    %6 = memref.load %arg2[%c1] : memref<2xi32, #tpu.memory_space<smem>>
    %c255_i32 = arith.constant 255 : i32
    %7 = vector.broadcast %c255_i32 : i32 to vector<1x256xi32>
    %8 = arith.cmpi eq, %3, %7 : vector<1x256xi32>
    %9 = vector.broadcast %5 : i1 to vector<1x256xi1>
    %10 = arith.andi %9, %8 : vector<1x256xi1>
    %11 = vector.broadcast %6 : i32 to vector<1x256xi32>
    %12 = arith.select %10, %11, %3 : vector<1x256xi1>, vector<1x256xi32>
    %cst = arith.constant dense<0xFF800000> : vector<256xf32>
    %13 = vector.multi_reduction <maximumf>, %1, %cst [0] : vector<4x256xf32> to vector<256xf32>
    %14 = vector.shape_cast %13 : vector<256xf32> to vector<1x256xf32>
    %15 = vector.broadcast %14 : vector<1x256xf32> to vector<4x256xf32>
    %16 = arith.subf %1, %15 : vector<4x256xf32>
    %17 = math.exp %16 : vector<4x256xf32>
    %cst_6 = arith.constant dense<0.000000e+00> : vector<256xf32>
    %18 = vector.multi_reduction <add>, %17, %cst_6 [0] : vector<4x256xf32> to vector<256xf32>
    %19 = vector.shape_cast %18 : vector<256xf32> to vector<1x256xf32>
    %20 = tpu.iota {dimensions = array<i32: 0>} : vector<4x256xi32>
    %21 = vector.broadcast %12 : vector<1x256xi32> to vector<4x256xi32>
    %22 = arith.cmpi eq, %20, %21 : vector<4x256xi32>
    %cst_7 = arith.constant 0.000000e+00 : f32
    %23 = vector.broadcast %cst_7 : f32 to vector<4x256xf32>
    %24 = arith.select %22, %17, %23 : vector<4x256xi1>, vector<4x256xf32>
    %cst_8 = arith.constant dense<0.000000e+00> : vector<256xf32>
    %25 = vector.multi_reduction <add>, %24, %cst_8 [0] : vector<4x256xf32> to vector<256xf32>
    %26 = vector.shape_cast %25 : vector<256xf32> to vector<1x256xf32>
    %27 = tpu.iota {dimensions = array<i32: 1>} : vector<1x256xi32>
    %c256_i32 = arith.constant 256 : i32
    %28 = arith.muli %arg1, %c256_i32 : i32
    %29 = vector.broadcast %28 : i32 to vector<1x256xi32>
    %30 = arith.addi %29, %27 : vector<1x256xi32>
    %c256_i32_9 = arith.constant 256 : i32
    %31 = vector.broadcast %c256_i32_9 : i32 to vector<1x256xi32>
    %32 = arith.cmpi slt, %30, %31 : vector<1x256xi32>
    %c0_i32_10 = arith.constant 0 : i32
    %33 = vector.broadcast %c0_i32_10 : i32 to vector<1x256xi32>
    %34 = arith.cmpi sge, %12, %33 : vector<1x256xi32>
    %c4_i32 = arith.constant 4 : i32
    %35 = vector.broadcast %c4_i32 : i32 to vector<1x256xi32>
    %36 = arith.cmpi slt, %12, %35 : vector<1x256xi32>
    %37 = arith.andi %34, %36 : vector<1x256xi1>
    %38 = tpu.reciprocal %19 {approx = true} : vector<1x256xf32> -> vector<1x256xf32>
    %39 = arith.mulf %26, %38 : vector<1x256xf32>
    %cst_11 = arith.constant 0.000000e+00 : f32
    %40 = vector.broadcast %cst_11 : f32 to vector<1x256xf32>
    %41 = arith.select %32, %39, %40 : vector<1x256xi1>, vector<1x256xf32>
    %42 = vector.shape_cast %41 : vector<1x256xf32> to vector<1x1x256xf32>
    %cst_12 = arith.constant dense<0.000000e+00> : vector<1xf32>
    %43 = vector.multi_reduction <add>, %42, %cst_12 [1, 2] : vector<1x1x256xf32> to vector<1xf32>
    %44 = vector.shape_cast %43 : vector<1xf32> to vector<1x1x1xf32>
    %45 = vector.extract %44[0, 0, 0] : f32 from vector<1x1x1xf32>
    %46 = arith.andi %32, %37 : vector<1x256xi1>
    %cst_13 = arith.constant 1.000000e+00 : f32
    %cst_14 = arith.constant 0.000000e+00 : f32
    %47 = vector.broadcast %cst_13 : f32 to vector<1x256xf32>
    %48 = vector.broadcast %cst_14 : f32 to vector<1x256xf32>
    %49 = arith.select %46, %47, %48 : vector<1x256xi1>, vector<1x256xf32>
    %50 = vector.shape_cast %49 : vector<1x256xf32> to vector<1x1x256xf32>
    %cst_15 = arith.constant dense<0.000000e+00> : vector<1xf32>
    %51 = vector.multi_reduction <add>, %50, %cst_15 [1, 2] : vector<1x1x256xf32> to vector<1xf32>
    %52 = vector.shape_cast %51 : vector<1xf32> to vector<1x1x1xf32>
    %53 = vector.extract %52[0, 0, 0] : f32 from vector<1x1x1xf32>
    %54 = vector.broadcast %45 : f32 to vector<8x128xf32>
    %c0_16 = arith.constant 0 : index
    %c0_17 = arith.constant 0 : index
    %c0_18 = arith.constant 0 : index
    %c0_19 = arith.constant 0 : index
    %55 = vector.load %arg5[%c0_16, %c0_17, %c0_18, %c0_19] : memref<1x1x8x128xf32, #tpu.memory_space<vmem>>, vector<1x1x8x128xf32>
    %56 = vector.shape_cast %55 : vector<1x1x8x128xf32> to vector<8x128xf32>
    %57 = vector.shape_cast %54 : vector<8x128xf32> to vector<1x1x8x128xf32>
    tpu.vector_store %arg5[%c0_16, %c0_17, %c0_18, %c0_19], %57 {strides = array<i32>} : memref<1x1x8x128xf32, #tpu.memory_space<vmem>>, vector<1x1x8x128xf32>,
    %58 = vector.broadcast %53 : f32 to vector<8x128xf32>
    %c0_20 = arith.constant 0 : index
    %c0_21 = arith.constant 0 : index
    %c0_22 = arith.constant 0 : index
    %c0_23 = arith.constant 0 : index
    %59 = vector.load %arg6[%c0_20, %c0_21, %c0_22, %c0_23] : memref<1x1x8x128xf32, #tpu.memory_space<vmem>>, vector<1x1x8x128xf32>
    %60 = vector.shape_cast %59 : vector<1x1x8x128xf32> to vector<8x128xf32>
    %61 = vector.shape_cast %58 : vector<8x128xf32> to vector<1x1x8x128xf32>
    tpu.vector_store %arg6[%c0_20, %c0_21, %c0_22, %c0_23], %61 {strides = array<i32>} : memref<1x1x8x128xf32, #tpu.memory_space<vmem>>, vector<1x1x8x128xf32>,
    return
  }
  func.func @transform_0(%arg0: i32, %arg1: i32, %arg2: memref<2xi32, #tpu.memory_space<smem>>) -> (i32, i32, i32) {
    %c0_i32 = arith.constant 0 : i32
    %c0_i32_0 = arith.constant 0 : i32
    return %arg0, %c0_i32, %arg1 : i32, i32, i32
  }
  func.func @transform_1(%arg0: i32, %arg1: i32, %arg2: memref<2xi32, #tpu.memory_space<smem>>) -> (i32, i32, i32) {
    %c0_i32 = arith.constant 0 : i32
    %c0_i32_0 = arith.constant 0 : i32
    return %arg0, %c0_i32, %arg1 : i32, i32, i32
  }
  func.func @transform_2(%arg0: i32, %arg1: i32, %arg2: memref<2xi32, #tpu.memory_space<smem>>) -> (i32, i32, i32, i32) {
    %c0_i32 = arith.constant 0 : i32
    %c0_i32_0 = arith.constant 0 : i32
    %c0_i32_1 = arith.constant 0 : i32
    return %arg0, %arg1, %c0_i32, %c0_i32_0 : i32, i32, i32, i32
  }
  func.func @transform_3(%arg0: i32, %arg1: i32, %arg2: memref<2xi32, #tpu.memory_space<smem>>) -> (i32, i32, i32, i32) {
    %c0_i32 = arith.constant 0 : i32
    %c0_i32_0 = arith.constant 0 : i32
    %c0_i32_1 = arith.constant 0 : i32
    return %arg0, %arg1, %c0_i32, %c0_i32_0 : i32, i32, i32, i32
  }
}

</mosaic_0001>

<bundles_post_ra>
// kernel: tpu_custom_call.1
= control target key start
LH: loop header
LB: loop body
LE: loop exit
PB: predicated region body
PF: predicated region fallthrough
CT: control target
= control target key end

     0   :  { %s1195_s0 = inlined_call_operand.hbm [shape: s32[2], index: 0, kind: input, shape index: {}]   ;;  %s1196_s1 = inlined_call_operand.hbm [shape: f32[2,4,256], index: 1, kind: input, shape index: {}]   ;;  %s1197_s2 = inlined_call_operand.hbm [shape: s32[2,1,256], index: 2, kind: input, shape index: {}]   ;;  %s1198_s3 = inlined_call_operand.hbm [shape: f32[2,1,8,128], index: 3, kind: output, shape index: {0}]   ;;  %s1199_s4 = inlined_call_operand.hbm [shape: f32[2,1,8,128], index: 4, kind: output, shape index: {1}]  }
   0x1   :  { %s696_s17 = scalar_lea.hbm %s1195_s0, 16 }
   0x2   :  { %p697_p0 = scmp.ne.s32.totalorder %s1195_s0, %s696_s17  ;;  %p700_p1 = scmp.lt.u32.totalorder %s696_s17, %s1195_s0 }
   0x4   :  { %p702_p2 = pnand %p700_p1, %p697_p0 }
   0x6   :  { %705 = shalt.err (!%p702_p2)  }
   0x7   :  { %s888_s22 = smov [#allocation3]  }
   0x8   :  { %11 = dma.hbm_to_smem %s1195_s0, 16, %s888_s22, [#allocation2] }
   0x9   :  { %846 = dma.done.wait [#allocation2], 16 }
   0xa   :  { %847 = vsyncadd [#allocation2], 4294967280 }
   0xb   :  { %13 = sfence }
   0xc   :  { %14 = vsyncpa [#allocation5], 0 }
   0xd   :  { %16 = vsyncpa [#allocation5 + $0x1], 0 }
   0xe   :  { %17 = vsyncpa [#allocation8], 0 }
   0xf   :  { %19 = vsyncpa [#allocation8 + $0x1], 0 }
  0x10   :  { %20 = vsyncpa [#allocation6], 0 }
  0x11   :  { %22 = vsyncpa [#allocation6 + $0x1], 0 }
  0x12   :  { %23 = vsyncpa [#allocation11], 0 }
  0x13   :  { %25 = vsyncpa [#allocation11 + $0x1], 0  ;;  %s932_s25 = smov 0   ;;  %s934_s26 = smov 0  }
  0x14   :  { %s936_s27 = smov 0   ;;  %s938_s28 = smov 0  }
  0x15   :  { %s940_s0 = smov 0   ;;  %s942_s29 = smov 0  }
  0x16 LB: > { %s586_s30 = sadd.s32 4294967295, %s886_s29   ;;  %s587_s5 = sadd.s32 4294967294, %s886_s29   ;;  %s886_s29 = sphi %s942_s29, %s31_s29   ;;  %s882_s0 = sphi %s940_s0, %s1219_s0   ;;  %s878_s28 = sphi %s938_s28, %s1218_s28   ;;  %s874_s27 = sphi %s936_s27, %s1217_s27   ;;  %s870_s26 = sphi %s934_s26, %s1216_s26   ;;  %s866_s25 = sphi %s932_s25, %s1215_s25  }
  0x17   : > { %s43_s6 = sadd.s32 1, %s882_s0  ;;  %s52_s7 = sadd.s32 1, %s874_s27 }
  0x18   : > { %p45_p3 = scmp.ge.s32.totalorder %s43_s6, 2  ;;  %p59_p4 = scmp.ne.s32.totalorder %s874_s27, %s870_s26 }
  0x19   : > { %p60_p5 = scmp.eq.s32.totalorder %s886_s29, 0  ;;  %p65_p6 = scmp.ne.s32.totalorder %s870_s26, %s866_s25 }
  0x1a   : > { %s1221_s6 = smov (%p45_p3, %s43_s6), 0  ;;  %p66_p8 = scmp.eq.s32.totalorder %s586_s30, 0 }
  0x1b   : > { %p973_p7 = por %p60_p5, %p59_p4  ;;  %s47_s9 = ssub.s32 %s882_s0, %s1221_s6 }
  0x1c   : > { %p119_p9 = scmp.eq.s32.totalorder %s586_s30, 1  ;;  %p50_p10 = scmp.eq.s32.totalorder %s47_s9, 0 }
  0x1d   : > { %p979_p11 = por %p66_p8, %p65_p6  ;;  %p125_p13 = scmp.eq.s32.totalorder %s587_s5, 1 }
  0x1e   : > { %p983_p12 = por %p119_p9, %p59_p4  ;;  %p636_p2 = scmp.lt.s32.totalorder %s886_s29, 2 }
  0x1f   : > { %s1203_s10 = scalar_select %p979_p11, 1, 0 }
  0x20   : > { %s1204_s11 = scalar_select %p983_p12, 1, 0 }
  0x21   : > { %s988_s12 = scalar_select %p50_p10, %s874_s27, %s52_s7  }
  0x22   : > { %p990_p0 = por %p125_p13, %p65_p6  ;;  %s997_s14 = sand.u32 1, %s874_s27  }
  0x23   : > { %s590_s15 = sshll.u32 %s997_s14, 3  ;;  %s608_s16 = sshll.u32 %s882_s0, 7 }
  0x24   : > { %s1205_s13 = scalar_select %p990_p0, 1, 0 }
  0x25   : > { %s1004_s19 = scalar_lea.hbm %s1196_s1, %s608_s16  ;;  %s177_s20 = scalar_lea.vmem [#allocation4], %s590_s15 }
  0x26   : > { %s187_s21 = sshll.u32 %s177_s20, 4  ;;  %p1010_p3 = pnand %p636_p2, %p973_p7  ;;  %s1006_s21 = int_to_ptr.vmem [resolvable:$true] %s187_s21 }
  0x27   : > { %s174_s23 = scalar_lea.sflag [#allocation5], %s997_s14  ;;  %s706_s24 = scalar_lea.hbm %s1004_s19, 128 }
  0x28   : > { %p707_p6 = scmp.ne.s32.totalorder %s1004_s19, %s706_s24  ;;  %p708_p8 = pneg %p1010_p3 }
  0x29   : > { %s711_s7 = scalar_lea.hbm %s1196_s1, 256  ;;  %p712_p7 = scmp.lt.u32.totalorder %s1004_s19, %s1196_s1 }
  0x2a   : > { %p709_p9 = pnand %p708_p8, %p707_p6  ;;  %p713_p13 = scmp.lt.u32.totalorder %s711_s7, %s706_s24 }
  0x2b   : > { %p715_p1 = scmp.lt.u32.totalorder %s706_s24, %s1004_s19 }
  0x2c   : > { %p710_p10 = pneg %p709_p9  ;;  %p714_p2 = por %p713_p13, %p712_p7 }
  0x2e   : > { %p716_p4 = por %p715_p1, %p714_p2 }
  0x30   : > { %p717_p5 = pnand %p716_p4, %p710_p10 }
  0x32   : > { %720 = shalt.err (!%p717_p5)
}
  0x33   : > { %s721_s15 = scalar_lea.vmem %s1006_s21, 128  ;;  %s889_s16 = smov [#allocation4]  }
  0x34   : > { %p722_p6 = scmp.ne.s32.totalorder %s1006_s21, %s721_s15  ;;  %s726_s17 = sshll.u32 %s889_s16, 4  ;;  %s727_s17 = int_to_ptr.vmem [resolvable:$false] %s726_s17 }
  0x35   : > { %s728_s18 = scalar_lea.vmem %s727_s17, 256  ;;  %p729_p12 = scmp.lt.s32.totalorder %s1006_s21, %s727_s17 }
  0x36   : > { %p724_p9 = pnand %p722_p6, %p708_p8  ;;  %p730_p7 = scmp.lt.s32.totalorder %s728_s18, %s721_s15 }
  0x38   : > { %p725_p0 = pneg %p724_p9  ;;  %p731_p13 = por %p730_p7, %p729_p12 }
  0x3a   : > { %p732_p1 = pnand %p731_p13, %p725_p0 }
  0x3c   : > { %735 = shalt.err (!%p732_p1)
}
  0x3d   : > { %625 = dma.hbm_to_vmem [thread:$0]  (!%p1010_p3), %s1004_s19, 128, %s1006_s21, %s174_s23  }
  0x3e   : > { %p1207_p4 = scmp.lt.s32.totalorder %s886_s29, 3  ;;  %p1208_p5 = scmp.ge.s32.totalorder %s886_s29, 1 }
  0x3f   : > { %s593_s24 = sshll.u32 %s997_s14, 1  ;;  %s609_s30 = sshll.u32 %s882_s0, 5 }
  0x40   : > { %p1046_p10 = pnand %p1208_p5, %p1207_p4  ;;  %s1055_s8 = scalar_lea.hbm %s1197_s2, %s609_s30 }
  0x41   : > { %s198_s9 = scalar_lea.vmem [#allocation7], %s593_s24  ;;  %s195_s19 = scalar_lea.sflag [#allocation8], %s997_s14 }
  0x42   : > { %s1209_s20 = scalar_select %p1046_p10, 1, 0 }
  0x43   : > { %s208_s15 = sshll.u32 %s198_s9, 4  ;;  %s736_s21 = scalar_lea.hbm %s1055_s8, 32  ;;  %s209_s15 = int_to_ptr.vmem [resolvable:$true] %s208_s15 }
  0x44   : > { %p737_p12 = scmp.ne.s32.totalorder %s1055_s8, %s736_s21  ;;  %s741_s17 = scalar_lea.hbm %s1197_s2, 64 }
  0x45   : > { %p742_p6 = scmp.lt.u32.totalorder %s1055_s8, %s1197_s2  ;;  %p743_p9 = scmp.lt.u32.totalorder %s741_s17, %s736_s21 }
  0x46   : > { %p739_p0 = pnand %p737_p12, %p708_p8  ;;  %p745_p13 = scmp.lt.u32.totalorder %s736_s21, %s1055_s8 }
  0x47   : > { %p744_p7 = por %p743_p9, %p742_p6 }
  0x48   : > { %p740_p2 = pneg %p739_p0 }
  0x49   : > { %p746_p1 = por %p745_p13, %p744_p7 }
  0x4b   : > { %p747_p4 = pnand %p746_p1, %p740_p2 }
  0x4d   : > { %750 = shalt.err (!%p747_p4)
}
  0x4e   : > { %s751_s14 = scalar_lea.vmem %s209_s15, 32  ;;  %s890_s24 = smov [#allocation7]  }
  0x4f   : > { %p752_p5 = scmp.ne.s32.totalorder %s209_s15, %s751_s14  ;;  %s756_s5 = sshll.u32 %s890_s24, 4  ;;  %s757_s5 = int_to_ptr.vmem [resolvable:$false] %s756_s5 }
  0x50   : > { %s758_s7 = scalar_lea.vmem %s757_s5, 64  ;;  %p759_p11 = scmp.lt.s32.totalorder %s209_s15, %s757_s5 }
  0x51   : > { %p754_p12 = pnand %p752_p5, %p708_p8  ;;  %p760_p10 = scmp.lt.s32.totalorder %s758_s7, %s751_s14 }
  0x53   : > { %p755_p0 = pneg %p754_p12  ;;  %p761_p6 = por %p760_p10, %p759_p11 }
  0x55   : > { %p762_p9 = pnand %p761_p6, %p755_p0 }
  0x57   : > { %765 = shalt.err (!%p762_p9)
}
  0x58   : > { %628 = dma.hbm_to_vmem [thread:$0]  (!%p1010_p3), %s1055_s8, 32, %s209_s15, %s195_s19  }
  0x59   : > { %p1210_p2 = scmp.ne.s32.totalorder %s1209_s20, 0 }
  0x5a   : > { %s1080_s9 = sand.u32 (!%p1210_p2), 1, %s870_s26   ;;  %p1211_p11 = scmp.ne.s32.totalorder (!%p1210_p2), %s1203_s10, 0 }
  0x5b   : > { %217 = sbr.rel (%p1210_p2) target bundleno = 409 (0x199), region = 28  ;;  %s1083_s21 = sshll.u32 (!%p1210_p2), %s1080_s9, 3 }
  0x5c   : > { %s220_s23 = scalar_lea.sflag (!%p1210_p2), [#allocation5], %s1080_s9  ;;  %s223_s16 = scalar_lea.vmem (!%p1210_p2), [#allocation4], %s1083_s21 }
  0x62   : > { %849 = dma.done.wait (%p1211_p11), %s220_s23, 128  }
  0x63   : > { %851 = vsyncadd (%p1211_p11), %s220_s23, 4294967168  ;;  %s598_s22 = sshll.u32 %s1080_s9, 1  ;;  %s229_s20 = scalar_lea.sflag [#allocation8], %s1080_s9 }
  0x64   : > { %s232_s8 = scalar_lea.vmem [#allocation7], %s598_s22 }
  0x65   : > { %853 = dma.done.wait (%p1211_p11), %s229_s20, 32  }
  0x66   : > { %855 = vsyncadd (%p1211_p11), %s229_s20, 4294967264  ;;  %s269_s15 = sld [smem:[#allocation3]]  ;;  %vm282_vm0 = vcmask 1043456   ;;  %v267_v0 = vld [vmem:[%s223_s16] sm:$0xff]  ;;  %s601_s10 = sld [smem:[#allocation3 + $0x1]]  ;;  %v321_v18 = vlaneseq  ;;  %v891_v57 = vmov 0  }
  0x67   : > { %v280_v1 = vcombine.high %v267_v0, %v267_v0  ;;  %v283_v2 = vsel %vm282_vm0, %v267_v0, -inf  ;;  %v268_v15 = vld [vmem:[%s232_s8] sm:$0x3]  ;;  %vm367_vm11 = vcmask 1040384   ;;  %s604_s17 = sshll.u32 %s878_s28, 7  ;;  %s257_s18 = scalar_lea.vmem [#allocation9], %s1083_s21 }
  0x68   : > { %v284_v3 = vrot.slane %v283_v2, 4  ;;  %vm272_vm1 = vcmp.eq.s32.totalorder %v268_v15, 255  ;;  %v322_v21 = vshrl.u32 %v321_v18, 7  ;;  %s431_s30 = sshll.u32 %s257_s18, 4  ;;  %s264_s14 = scalar_lea.vmem [#allocation10], %s1083_s21  ;;  %s1115_s30 = int_to_ptr.vmem [resolvable:$true] %s431_s30 }
  0x69   : > { %v290_v4 = vsel %vm282_vm0, %v280_v1, -inf  ;;  %s445_s24 = sshll.u32 %s264_s14, 4  ;;  %s1113_s23 = scalar_lea.hbm %s1198_s3, %s604_s17  ;;  %s1117_s24 = int_to_ptr.vmem [resolvable:$true] %s445_s24 }
  0x6a   : > { %v285_v5 = vmax.f32 %v283_v2, %v284_v3  ;;  %v291_v6 = vrot.slane %v290_v4, 4  ;;  %v325_v24 = vsub.s32 0, %v322_v21  ;;  %v329_v26 = vsub.s32 1, %v322_v21  ;;  %s412_s22 = scalar_lea.sflag [#allocation6], %s1080_s9  ;;  %s766_s20 = scalar_lea.vmem %s1115_s30, 128 }
  0x6b   : > { %p767_p8 = scmp.ne.s32.totalorder %s1115_s30, %s766_s20  ;;  %p1212_p10 = scmp.ne.s32.totalorder %s1204_s11, 0 }
  0x6c   : > { %p270_p3 = scmp.ne.s32.totalorder %s269_s15, 0  ;;  %v286_v7 = vrot.slane %v285_v5, 2  ;;  %v292_v8 = vmax.f32 %v290_v4, %v291_v6  ;;  %v277_v22 = vstv %s601_s10  ;;  %v892_v4 = vmov 0.0   ;;  %s893_s8 = smov [#allocation9]  }
  0x6d   : > { %p768_p7 = pnand %p767_p8, %p1212_p10  ;;  %s770_s15 = sshll.u32 %s893_s8, 4  ;;  %s771_s15 = int_to_ptr.vmem [resolvable:$false] %s770_s15 }
  0x6e   : > { %v287_v9 = vmax.f32 %v285_v5, %v286_v7  ;;  %v293_v10 = vrot.slane %v292_v8, 2  ;;  %s273_s19 = scalar_select %p270_p3, 1, 0 }
  0x6f   : > { %p769_p13 = pneg %p768_p7  ;;  %p773_p1 = scmp.lt.s32.totalorder %s1115_s30, %s771_s15 }
  0x70   : > { %v288_v11 = vrot.slane %v287_v9, 1  ;;  %v294_v12 = vmax.f32 %v292_v8, %v293_v10  ;;  %v274_v16 = vstv %s273_s19  ;;  %s772_s19 = scalar_lea.vmem %s771_s15, 256 }
  0x71   : > { %vm275_vm2 = vcmp.eq.s32.totalorder %v274_v16, 1  ;;  %p774_p4 = scmp.lt.s32.totalorder %s772_s19, %s766_s20 }
  0x72   : > { %v289_v13 = vmax.f32 %v287_v9, %v288_v11  ;;  %v295_v14 = vrot.slane %v294_v12, 1  ;;  %vm276_vm3 = vmand %vm275_vm2, %vm272_vm1 }
  0x73   : > { %v278_v25 = vsel %vm276_vm3, %v277_v22, %v268_v15  ;;  %p775_p5 = por %p774_p4, %p773_p1 }
  0x74   : > { %v296_v17 = vmax.f32 %v294_v12, %v295_v14  ;;  %v326_v27 = vrot.slane %v278_v25, %v325_v24  ;;  %v330_v28 = vrot.slane %v278_v25, %v329_v26  ;;  %vm358_vm6 = vcmp.ge.s32.totalorder %v278_v25, 0 }
  0x75   : > { %vm359_vm7 = vcmp.lt.s32.totalorder %v278_v25, 4  ;;  %p776_p12 = pnand %p775_p5, %p769_p13 }
  0x76   : > { %v299_v19 = vcombine.low %v289_v13, %v296_v17  ;;  %vm331_vm4 = vcmp.eq.s32.totalorder %v322_v21, %v326_v27  ;;  %vm332_vm5 = vcmp.eq.s32.totalorder %v322_v21, %v330_v28  ;;  %vm360_vm8 = vmand %vm358_vm6, %vm359_vm7 }
  0x77   : > { %v380_v58 = vsel %vm360_vm8, 1, %v891_v57 }
  0x78   : > { %v301_v20 = vsub.f32 %v267_v0, %v299_v19  ;;  %v384_v61 = vrot.slane %v380_v58, %v325_v24  ;;  %v388_v62 = vrot.slane %v380_v58, %v329_v26 }
  0x7a   : > { %v302_v23 = vmul.f32 1.442695, %v301_v20  ;;  %vm389_vm9 = vcmp.ne.s32.totalorder %v384_v61, 0  ;;  %vm390_vm10 = vcmp.ne.s32.totalorder %v388_v62, 0 }
  0x7b   : > { %v393_v5 = vsel %vm389_vm9, 1.0, %v892_v4  ;;  %v394_v6 = vsel %vm390_vm10, 1.0, %v892_v4 }
  0x7c   : > { %690 = vpow2.f32 %v302_v23  ;;  %v395_v10 = vsel %vm367_vm11, %v393_v5, 0.0  ;;  %v396_v11 = vsel %vm367_vm11, %v394_v6, 0.0 }
  0x7d   : > { %v397_v13 = vadd.f32 %v396_v11, %v395_v10 }
  0x86   : > { %v691_v29 = vpop.eup %690 }
  0x87   : > { %v305_v30 = vcombine.high %v691_v29, %v691_v29  ;;  %v307_v31 = vsel %vm282_vm0, %v691_v29, 0.0  ;;  %v333_v32 = vsel %vm331_vm4, %v691_v29, 0.0 }
  0x88   : > { %v308_v33 = vrot.slane %v307_v31, 4  ;;  %v335_v34 = vsel %vm282_vm0, %v333_v32, 0.0 }
  0x89   : > { %v314_v35 = vsel %vm282_vm0, %v305_v30, 0.0  ;;  %v334_v36 = vsel %vm332_vm5, %v305_v30, 0.0  ;;  %v336_v37 = vrot.slane %v335_v34, 4 }
  0x8a   : > { %v309_v38 = vadd.f32 %v308_v33, %v307_v31  ;;  %v315_v39 = vrot.slane %v314_v35, 4  ;;  %v342_v40 = vsel %vm282_vm0, %v334_v36, 0.0 }
  0x8b   : > { %v337_v41 = vadd.f32 %v336_v37, %v335_v34  ;;  %v343_v42 = vrot.slane %v342_v40, 4 }
  0x8c   : > { %v310_v43 = vrot.slane %v309_v38, 2  ;;  %v316_v44 = vadd.f32 %v315_v39, %v314_v35 }
  0x8d   : > { %v344_v45 = vadd.f32 %v343_v42, %v342_v40  ;;  %v338_v48 = vrot.slane %v337_v41, 2 }
  0x8e   : > { %v311_v46 = vadd.f32 %v310_v43, %v309_v38  ;;  %v317_v47 = vrot.slane %v316_v44, 2 }
  0x8f   : > { %v345_v51 = vrot.slane %v344_v45, 2  ;;  %v339_v54 = vadd.f32 %v338_v48, %v337_v41 }
  0x90   : > { %v312_v49 = vrot.slane %v311_v46, 1  ;;  %v318_v50 = vadd.f32 %v317_v47, %v316_v44 }
  0x91   : > { %v346_v56 = vadd.f32 %v345_v51, %v344_v45  ;;  %v340_v59 = vrot.slane %v339_v54, 1 }
  0x92   : > { %v313_v52 = vadd.f32 %v312_v49, %v311_v46  ;;  %v319_v53 = vrot.slane %v318_v50, 1 }
  0x93   : > { %v347_v60 = vrot.slane %v346_v56, 1  ;;  %v341_v63 = vadd.f32 %v340_v59, %v339_v54 }
  0x94   : > { %v320_v55 = vadd.f32 %v319_v53, %v318_v50  ;;  %692 = vrcp.f32 %v313_v52 }
  0x95   : > { %v348_v0 = vadd.f32 %v347_v60, %v346_v56 }
  0x96   : > { %694 = vrcp.f32 %v320_v55 }
  0x9e   : > { %v693_v1 = vpop.eup %692 }
  0x9f   : > { %v363_v2 = vmul.f32 %v693_v1, %v341_v63 }
  0xa0   : > { %v695_v3 = vpop.eup %694 }
  0xa1   : > { %v364_v7 = vmul.f32 %v695_v3, %v348_v0  ;;  %v368_v8 = vsel %vm367_vm11, %v363_v2, 0.0 }
  0xa3   : > { %v369_v9 = vsel %vm367_vm11, %v364_v7, 0.0 }
  0xa4   : > { %v370_v12 = vadd.f32 %v369_v9, %v368_v8 }
  0xa6   : > { %371 = vadd.xlane.f32.xlu0 %v370_v12 }
  0xaa   : > { %398 = vadd.xlane.f32.xlu0 %v397_v13 }
 0x133   : > { %v372_v14 = vpop.xlane.xlu0 %371 }
 0x134   : > { %v373_v15 = vrot.slane %v372_v14, 4 }
 0x136   : > { %v374_v16 = vadd.f32 %v373_v15, %v372_v14 }
 0x137   : > { %v399_v17 = vpop.xlane.xlu0 %398 }
 0x138   : > { %v375_v18 = vrot.slane %v374_v16, 2  ;;  %v400_v19 = vrot.slane %v399_v17, 4 }
 0x13a   : > { %v401_v20 = vadd.f32 %v400_v19, %v399_v17  ;;  %v376_v21 = vadd.f32 %v375_v18, %v374_v16 }
 0x13c   : > { %v402_v22 = vrot.slane %v401_v20, 2  ;;  %v377_v23 = vrot.slane %v376_v21, 1 }
 0x13e   : > { %v403_v24 = vadd.f32 %v402_v22, %v401_v20  ;;  %v378_v25 = vadd.f32 %v377_v23, %v376_v21 }
 0x140   : > { %610 = vpush %v378_v25  ;;  %v404_v26 = vrot.slane %v403_v24, 1 }
 0x142   : > { %v405_v27 = vadd.f32 %v404_v26, %v403_v24 }
 0x144   : > { %612 = vpush %v405_v27 }
 0x171   : > { %s611_s16 = spop %610 }
 0x172   : > { %v407_v28 = vstv %s611_s16 }
 0x173   : > { %408 = vst [vmem:[%s257_s18] sm:$0xff] %v407_v28 }
 0x174   : > { %779 = shalt.err (!%p776_p12)
}
 0x175   : > { %s780_s10 = scalar_lea.hbm %s1113_s23, 128  ;;  %s784_s7 = scalar_lea.hbm %s1198_s3, 256 }
 0x176   : > { %p781_p0 = scmp.ne.s32.totalorder %s1113_s23, %s780_s10  ;;  %p785_p2 = scmp.lt.u32.totalorder %s1113_s23, %s1198_s3 }
 0x177   : > { %p786_p11 = scmp.lt.u32.totalorder %s784_s7, %s780_s10  ;;  %p788_p8 = scmp.lt.u32.totalorder %s780_s10, %s1113_s23 }
 0x178   : > { %p782_p6 = pnand %p781_p0, %p1212_p10 }
 0x179   : > { %p787_p3 = por %p786_p11, %p785_p2 }
 0x17a   : > { %p783_p9 = pneg %p782_p6 }
 0x17b   : > { %p789_p7 = por %p788_p8, %p787_p3 }
 0x17d   : > { %p790_p13 = pnand %p789_p7, %p783_p9 }
 0x17f   : > { %793 = shalt.err (!%p790_p13)
}
 0x180   : > { %618 = dma.vmem_to_hbm [thread:$0]  (%p1212_p10), %s1115_s30, 128, %s1113_s23, %s412_s22  }
 0x181   : > { %s613_s20 = spop %612  ;;  %s1146_s10 = scalar_lea.hbm %s1199_s4, %s604_s17 }
 0x182   : > { %v409_v29 = vstv %s613_s20  ;;  %s417_s18 = scalar_lea.sflag [#allocation11], %s1080_s9  ;;  %s794_s5 = scalar_lea.vmem %s1117_s24, 128 }
 0x183   : > { %410 = vst [vmem:[%s264_s14] sm:$0xff] %v409_v29  ;;  %p795_p1 = scmp.ne.s32.totalorder %s1117_s24, %s794_s5  ;;  %s894_s7 = smov [#allocation10]  }
 0x184   : > { %s798_s16 = sshll.u32 %s894_s7, 4  ;;  %s799_s16 = int_to_ptr.vmem [resolvable:$false] %s798_s16 }
 0x185   : > { %p796_p4 = pnand %p795_p1, %p1212_p10  ;;  %s800_s30 = scalar_lea.vmem %s799_s16, 256 }
 0x186   : > { %p801_p12 = scmp.lt.s32.totalorder %s1117_s24, %s799_s16  ;;  %p802_p0 = scmp.lt.s32.totalorder %s800_s30, %s794_s5 }
 0x187   : > { %p797_p5 = pneg %p796_p4 }
 0x188   : > { %p803_p6 = por %p802_p0, %p801_p12 }
 0x18a   : > { %p804_p9 = pnand %p803_p6, %p797_p5 }
 0x18c   : > { %807 = shalt.err (!%p804_p9)
}
 0x18d   : > { %s808_s28 = scalar_lea.hbm %s1146_s10, 128  ;;  %s812_s17 = scalar_lea.hbm %s1199_s4, 256 }
 0x18e   : > { %p809_p2 = scmp.ne.s32.totalorder %s1146_s10, %s808_s28  ;;  %p813_p8 = scmp.lt.u32.totalorder %s1146_s10, %s1199_s4 }
 0x18f   : > { %p814_p7 = scmp.lt.u32.totalorder %s812_s17, %s808_s28  ;;  %p816_p1 = scmp.lt.u32.totalorder %s808_s28, %s1146_s10 }
 0x190   : > { %p810_p11 = pnand %p809_p2, %p1212_p10 }
 0x191   : > { %p815_p13 = por %p814_p7, %p813_p8 }
 0x192   : > { %p811_p3 = pneg %p810_p11 }
 0x193   : > { %p817_p4 = por %p816_p1, %p815_p13 }
 0x195   : > { %p818_p5 = pnand %p817_p4, %p811_p3 }
 0x197   : > { %821 = shalt.err (!%p818_p5)
}
 0x198   : > { %619 = dma.vmem_to_hbm [thread:$0]  (%p1212_p10), %s1117_s24, 128, %s1146_s10, %s417_s18  }
 0x199 PF: > { %s457_s22 = sand.u32 1, %s866_s25   ;;  %p1213_p12 = scmp.ne.s32.totalorder %s1205_s13, 0 }
 0x19a   : > { %p1214_p0 = scmp.ge.s32.totalorder %s886_s29, 2  ;;  %s458_s8 = scalar_lea.sflag [#allocation6], %s457_s22 }
 0x19c   : > { %p630_p6 = pnand %p1214_p0, %p1213_p12 }
 0x19e   : > { %857 = dma.done.wait (!%p630_p6), %s458_s8, 128  }
 0x19f   : > { %859 = vsyncadd (!%p630_p6), %s458_s8, 4294967168  ;;  %s467_s20 = scalar_lea.sflag [#allocation11], %s457_s22 }
 0x1a0   : > { %861 = dma.done.wait (!%p630_p6), %s467_s20, 128  }
 0x1a1   : > { %863 = vsyncadd (!%p630_p6), %s467_s20, 4294967168  ;;  %s31_s29 = sadd.s32 1, %s886_s29   ;;  %s1215_s25 = smov %s870_s26 }
 0x1a2   : > { %p28_p9 = scmp.ge.s32.totalorder %s31_s29, 4   ;;  %s1216_s26 = smov %s874_s27 }
 0x1a3   : > { %s1217_s27 = smov %s988_s12  ;;  %s1218_s28 = smov %s882_s0 }
 0x1a4   : > { %s1219_s0 = smov %s1221_s6  ;;  %30 = sbr.rel (!%p28_p9) target bundleno = 22 (0x16), region = 103 }
 0x1ab   :  { %472 = vsyncpa [#allocation5], 1 }
 0x1ac   :  { %474 = vsyncpa [#allocation5 + $0x1], 1 }
 0x1ad   :  { %475 = vsyncpa [#allocation8], 1 }
 0x1ae   :  { %477 = vsyncpa [#allocation8 + $0x1], 1 }
 0x1af   :  { %478 = vsyncpa [#allocation6], 1 }
 0x1b0   :  { %480 = vsyncpa [#allocation6 + $0x1], 1 }
 0x1b1   :  { %481 = vsyncpa [#allocation11], 1 }
 0x1b2   :  { %483 = vsyncpa [#allocation11 + $0x1], 1 }

</bundles_post_ra>
